<compile_context>
chip_gen: v5e
topology: v5e:2x2
jax: 0.10.0
libtpu: 0.0.40
codegen_flags: <defaults>
</compile_context>

<pallas_src>
import jax
import jax.numpy as jnp
from jax import lax
from jax.experimental import pallas as pl
from jax.experimental.pallas import tpu as pltpu


def _lwal_kernel(flags_ref, x_ref, t_ref, ly_ref, loss_ref, ly_out_ref):
    # flags (SMEM f32[3]): [update_flag (exactly 0.0 or 1.0), decay_factor,
    #                       structure_loss_weight]
    u = flags_ref[0]
    decay = flags_ref[1]
    slw = flags_ref[2]

    x = x_ref[...]          # (B, D) f32
    t = t_ref[...]          # (B, C) f32 one-hot
    ly = ly_ref[...]        # (C, D) f32

    # ---- compute_centroids: per-class mean of x (zero rows for absent classes)
    # Scale each one-hot column by 1/count, then contract over batch on the MXU.
    counts = jnp.sum(t, axis=0, keepdims=True)                       # (1, C)
    inv_counts = 1.0 / jnp.where(counts > 0.0, counts, 1.0)
    centroids = lax.dot_general(
        t * inv_counts, x,
        dimension_numbers=(((0,), (0,)), ((), ())),                  # t^T @ x
        preferred_element_type=jnp.float32)                          # (C, D)

    # ---- contrastive (structure) loss: CE(centroids @ centroids.T, arange(C))
    score = lax.dot_general(
        centroids, centroids,
        dimension_numbers=(((1,), (1,)), ((), ())),                  # A @ A^T
        preferred_element_type=jnp.float32)                          # (C, C)
    m = jnp.max(score, axis=1, keepdims=True)
    lse = m + jnp.log(jnp.sum(jnp.exp(score - m), axis=1, keepdims=True))
    # diagonal of score == row-wise squared norm of centroids
    sqnorm = jnp.sum(centroids * centroids, axis=1, keepdims=True)   # (C, 1)
    structure_loss = jnp.mean(lse - sqnorm)

    # ---- update_learnt_centroids (EMA; absent classes keep the old row) ----
    # count_nonzero(centroid) == 0  <=>  squared norm == 0 (reuses sqnorm).
    nonzero = sqnorm > 0.0
    enc = jnp.where(nonzero, centroids, ly)
    ly_updated = decay * enc + (1.0 - decay) * ly

    # Branchless blend with the update flag.
    ly_final = u * ly_updated + (1.0 - u) * ly
    ly_out_ref[...] = ly_final                                       # single store

    # ---- cross_entropy_pull_loss with pairwise_dist against ly_final ----
    na = jnp.sum(x * x, axis=1, keepdims=True)                       # (B, 1)
    nb = lax.dot_general(                                            # (1, C), lane-major
        jnp.ones((1, ly_final.shape[1]), jnp.float32), ly_final * ly_final,
        dimension_numbers=(((1,), (1,)), ((), ())),
        preferred_element_type=jnp.float32)
    cross = lax.dot_general(
        x, ly_final,
        dimension_numbers=(((1,), (1,)), ((), ())),                  # x @ ly^T
        preferred_element_type=jnp.float32)                          # (B, C)
    dist = jnp.sqrt(jnp.maximum(na - 2.0 * cross + nb, 1e-12))

    neg = -dist
    mm = jnp.max(neg, axis=1, keepdims=True)
    logits = neg - mm - jnp.log(jnp.sum(jnp.exp(neg - mm), axis=1, keepdims=True))
    pull_loss = jnp.mean(jnp.sum(-t * logits, axis=1, keepdims=True))

    loss_ref[0] = u * slw * structure_loss + pull_loss

    # TODO(synk): self.maximum_element / self.maximum_norm / current_step /
    # stationary_steps / decay_factor exponential-decay bookkeeping are
    # host-side running statistics in the torch module (not part of the
    # returned values); omitted from the kernel.


def lwal_forward(x, target_onehot, learnt_y, *, update_centroids,
                 decay_factor=1.0, structure_loss_weight=1.0):
    """Pallas implementation of LearningWithAdaptiveLabels.forward.

    Returns (em_loss, new_learnt_y), mirroring the PyTorch module.
    """
    B, D = x.shape
    C = learnt_y.shape[0]
    assert target_onehot.shape == (B, C)
    assert learnt_y.shape == (C, D)

    flags = jnp.array(
        [1.0 if update_centroids else 0.0, decay_factor, structure_loss_weight],
        dtype=jnp.float32)

    loss, ly_new = pl.pallas_call(
        _lwal_kernel,
        out_shape=(
            jax.ShapeDtypeStruct((1,), jnp.float32),    # em_loss (scalar, SMEM)
            jax.ShapeDtypeStruct((C, D), jnp.float32),  # updated learnt_y
        ),
        in_specs=[
            pl.BlockSpec(memory_space=pltpu.MemorySpace.SMEM),   # flags
            pl.BlockSpec(memory_space=pltpu.MemorySpace.VMEM),   # x
            pl.BlockSpec(memory_space=pltpu.MemorySpace.VMEM),   # target one-hot
            pl.BlockSpec(memory_space=pltpu.MemorySpace.VMEM),   # learnt_y
        ],
        out_specs=(
            pl.BlockSpec(memory_space=pltpu.MemorySpace.SMEM),   # em_loss
            pl.BlockSpec(memory_space=pltpu.MemorySpace.VMEM),   # new learnt_y
        ),
    )(flags, x.astype(jnp.float32), target_onehot.astype(jnp.float32),
      learnt_y.astype(jnp.float32))

    return loss[0], ly_new


# ---------------- pure-JAX reference (mirrors the torch code) ----------------
def _reference_forward(x, t, learnt_y, update, decay, slw):
    true_y = jnp.argmax(t, axis=1)
    C, D = learnt_y.shape
    cents = []
    for i in range(C):
        mask = (true_y == i).astype(jnp.float32)[:, None]
        n = mask.sum()
        ci = jnp.where(n == 0, jnp.zeros((D,), jnp.float32),
                       (x * mask).sum(axis=0) / jnp.where(n == 0, 1.0, n))
        cents.append(ci)
    centroids = jnp.stack(cents)
    score = centroids @ centroids.T
    sl = jnp.mean(jax.nn.logsumexp(score, axis=1) - jnp.diag(score))
    nonzero = (jnp.count_nonzero(centroids, axis=1) > 0)[:, None]
    enc = jnp.where(nonzero, centroids, learnt_y)
    ly_new = decay * enc + (1.0 - decay) * learnt_y
    if update:
        ly_f, sloss = ly_new, sl
    else:
        ly_f, sloss = learnt_y, 0.0
    na = jnp.sum(x ** 2, axis=1)[:, None]
    nb = jnp.sum(ly_f ** 2, axis=1)[None, :]
    dist = jnp.sqrt(jnp.maximum(na - 2.0 * (x @ ly_f.T) + nb, 1e-12))
    logits = jax.nn.log_softmax(-dist, axis=1)
    pull = jnp.mean(jnp.sum(-t * logits, axis=1))
    return slw * sloss + pull, ly_f


if __name__ == "__main__":
    # Module config (synthetic, deterministic):
    #   latent_dim=128, num_classes=16, init_fn='onehot' -> eye(C, D).
    #   stationary_steps=1, current_step=1 => update_centroids True on this step;
    #   the False path (non-update steps) is also exercised below.
    B, D, C = 32, 128, 16
    decay_factor = 1.0
    structure_loss_weight = 1.0

    key = jax.random.PRNGKey(0)
    kx, kt = jax.random.split(key)
    x = jax.random.normal(kx, (B, D), dtype=jnp.float32)
    labels = jax.random.randint(kt, (B,), 0, C)
    target = jax.nn.one_hot(labels, C, dtype=jnp.float32)
    learnt_y = jnp.eye(C, D, dtype=jnp.float32)   # torch.eye(num_classes, latent_dim)

    ok = True
    for update in (True, False):
        loss, ly_new = lwal_forward(
            x, target, learnt_y,
            update_centroids=update,
            decay_factor=decay_factor,
            structure_loss_weight=structure_loss_weight)
        loss = jax.block_until_ready(loss)
        ly_new = jax.block_until_ready(ly_new)

        ref_loss, ref_ly = _reference_forward(
            x, target, learnt_y, update, decay_factor, structure_loss_weight)

        ok &= bool(jnp.allclose(loss, ref_loss, rtol=1e-4, atol=1e-4))
        ok &= bool(jnp.allclose(ly_new, ref_ly, rtol=1e-4, atol=1e-4))

    assert ok
    print("KERNEL_OK")
</pallas_src>

<mosaic_0001>
module attributes {stable_mosaic.version = 11 : i64} {
  func.func @_lwal_kernel(%arg0: memref<3xf32, #tpu.memory_space<smem>>, %arg1: memref<32x128xf32, #tpu.memory_space<vmem>>, %arg2: memref<32x16xf32, #tpu.memory_space<vmem>>, %arg3: memref<16x128xf32, #tpu.memory_space<vmem>>, %arg4: memref<1xf32, #tpu.memory_space<smem>>, %arg5: memref<16x128xf32, #tpu.memory_space<vmem>>) attributes {dimension_semantics = [], scalar_prefetch = 0 : i64, scratch_operands = 0 : i64, tpu.core_type = #tpu.core_type<tc>} {
    %c0 = arith.constant 0 : index
    %0 = memref.load %arg0[%c0] : memref<3xf32, #tpu.memory_space<smem>>
    %c1 = arith.constant 1 : index
    %1 = memref.load %arg0[%c1] : memref<3xf32, #tpu.memory_space<smem>>
    %c2 = arith.constant 2 : index
    %2 = memref.load %arg0[%c2] : memref<3xf32, #tpu.memory_space<smem>>
    %c0_0 = arith.constant 0 : index
    %c0_1 = arith.constant 0 : index
    %3 = vector.load %arg1[%c0_0, %c0_1] : memref<32x128xf32, #tpu.memory_space<vmem>>, vector<32x128xf32>
    %c0_2 = arith.constant 0 : index
    %c0_3 = arith.constant 0 : index
    %4 = vector.load %arg2[%c0_2, %c0_3] : memref<32x16xf32, #tpu.memory_space<vmem>>, vector<32x16xf32>
    %c0_4 = arith.constant 0 : index
    %c0_5 = arith.constant 0 : index
    %5 = vector.load %arg3[%c0_4, %c0_5] : memref<16x128xf32, #tpu.memory_space<vmem>>, vector<16x128xf32>
    %cst = arith.constant dense<0.000000e+00> : vector<16xf32>
    %6 = vector.multi_reduction <add>, %4, %cst [0] : vector<32x16xf32> to vector<16xf32>
    %7 = vector.shape_cast %6 : vector<16xf32> to vector<1x16xf32>
    %cst_6 = arith.constant 0.000000e+00 : f32
    %8 = vector.broadcast %cst_6 : f32 to vector<1x16xf32>
    %9 = arith.cmpf ogt, %7, %8 : vector<1x16xf32>
    %cst_7 = arith.constant 1.000000e+00 : f32
    %10 = vector.broadcast %cst_7 : f32 to vector<1x16xf32>
    %11 = arith.select %9, %7, %10 : vector<1x16xi1>, vector<1x16xf32>
    %cst_8 = arith.constant 1.000000e+00 : f32
    %12 = vector.broadcast %cst_8 : f32 to vector<1x16xf32>
    %13 = arith.divf %12, %11 : vector<1x16xf32>
    %14 = vector.broadcast %13 : vector<1x16xf32> to vector<32x16xf32>
    %15 = arith.mulf %4, %14 : vector<32x16xf32>
    %cst_9 = arith.constant dense<0.000000e+00> : vector<16x128xf32>
    %16 = tpu.matmul %15, %3, %cst_9 {dimension_numbers = #tpu.dot_dimension_numbers<[0], [0], [1], [1], [0, 1, 1, 1], [], []>} : vector<32x16xf32>, vector<32x128xf32>, vector<16x128xf32> -> vector<16x128xf32>
    %cst_10 = arith.constant dense<0.000000e+00> : vector<16x16xf32>
    %17 = tpu.matmul %16, %16, %cst_10 {dimension_numbers = #tpu.dot_dimension_numbers<[1], [1], [0], [0], [0, 0, 1, 0], [], []>} : vector<16x128xf32>, vector<16x128xf32>, vector<16x16xf32> -> vector<16x16xf32>
    %cst_11 = arith.constant dense<0xFF800000> : vector<16xf32>
    %18 = vector.multi_reduction <maximumf>, %17, %cst_11 [1] : vector<16x16xf32> to vector<16xf32>
    %19 = vector.shape_cast %18 : vector<16xf32> to vector<16x1xf32>
    %20 = vector.broadcast %19 : vector<16x1xf32> to vector<16x16xf32>
    %21 = arith.subf %17, %20 : vector<16x16xf32>
    %22 = math.exp %21 : vector<16x16xf32>
    %cst_12 = arith.constant dense<0.000000e+00> : vector<16xf32>
    %23 = vector.multi_reduction <add>, %22, %cst_12 [1] : vector<16x16xf32> to vector<16xf32>
    %24 = vector.shape_cast %23 : vector<16xf32> to vector<16x1xf32>
    %25 = math.log %24 : vector<16x1xf32>
    %26 = arith.addf %19, %25 : vector<16x1xf32>
    %27 = arith.mulf %16, %16 : vector<16x128xf32>
    %cst_13 = arith.constant dense<0.000000e+00> : vector<16xf32>
    %28 = vector.multi_reduction <add>, %27, %cst_13 [1] : vector<16x128xf32> to vector<16xf32>
    %29 = vector.shape_cast %28 : vector<16xf32> to vector<16x1xf32>
    %30 = arith.subf %26, %29 : vector<16x1xf32>
    %31 = vector.shape_cast %30 : vector<16x1xf32> to vector<1x16x1xf32>
    %cst_14 = arith.constant dense<0.000000e+00> : vector<1xf32>
    %32 = vector.multi_reduction <add>, %31, %cst_14 [1, 2] : vector<1x16x1xf32> to vector<1xf32>
    %33 = vector.shape_cast %32 : vector<1xf32> to vector<1x1x1xf32>
    %34 = vector.extract %33[0, 0, 0] : f32 from vector<1x1x1xf32>
    %cst_15 = arith.constant 1.600000e+01 : f32
    %35 = arith.divf %34, %cst_15 : f32
    %cst_16 = arith.constant 0.000000e+00 : f32
    %36 = vector.broadcast %cst_16 : f32 to vector<16x1xf32>
    %37 = arith.cmpf ogt, %29, %36 : vector<16x1xf32>
    %38 = vector.shape_cast %37 : vector<16x1xi1> to vector<16x1xi1>
    %39 = vector.broadcast %38 : vector<16x1xi1> to vector<16x128xi1>
    %40 = arith.select %39, %16, %5 : vector<16x128xi1>, vector<16x128xf32>
    %41 = vector.broadcast %1 : f32 to vector<16x128xf32>
    %42 = arith.mulf %41, %40 : vector<16x128xf32>
    %cst_17 = arith.constant 1.000000e+00 : f32
    %43 = arith.subf %cst_17, %1 : f32
    %44 = vector.broadcast %43 : f32 to vector<16x128xf32>
    %45 = arith.mulf %44, %5 : vector<16x128xf32>
    %46 = arith.addf %42, %45 : vector<16x128xf32>
    %47 = vector.broadcast %0 : f32 to vector<16x128xf32>
    %48 = arith.mulf %47, %46 : vector<16x128xf32>
    %cst_18 = arith.constant 1.000000e+00 : f32
    %49 = arith.subf %cst_18, %0 : f32
    %50 = vector.broadcast %49 : f32 to vector<16x128xf32>
    %51 = arith.mulf %50, %5 : vector<16x128xf32>
    %52 = arith.addf %48, %51 : vector<16x128xf32>
    %c0_19 = arith.constant 0 : index
    %c0_20 = arith.constant 0 : index
    %53 = vector.load %arg5[%c0_19, %c0_20] : memref<16x128xf32, #tpu.memory_space<vmem>>, vector<16x128xf32>
    tpu.vector_store %arg5[%c0_19, %c0_20], %52 {strides = array<i32>} : memref<16x128xf32, #tpu.memory_space<vmem>>, vector<16x128xf32>,
    %54 = arith.mulf %3, %3 : vector<32x128xf32>
    %cst_21 = arith.constant dense<0.000000e+00> : vector<32xf32>
    %55 = vector.multi_reduction <add>, %54, %cst_21 [1] : vector<32x128xf32> to vector<32xf32>
    %56 = vector.shape_cast %55 : vector<32xf32> to vector<32x1xf32>
    %cst_22 = arith.constant 1.000000e+00 : f32
    %57 = vector.broadcast %cst_22 : f32 to vector<1x128xf32>
    %58 = arith.mulf %52, %52 : vector<16x128xf32>
    %cst_23 = arith.constant dense<0.000000e+00> : vector<1x16xf32>
    %59 = tpu.matmul %57, %58, %cst_23 {dimension_numbers = #tpu.dot_dimension_numbers<[1], [1], [0], [0], [0, 0, 1, 0], [], []>} : vector<1x128xf32>, vector<16x128xf32>, vector<1x16xf32> -> vector<1x16xf32>
    %cst_24 = arith.constant dense<0.000000e+00> : vector<32x16xf32>
    %60 = tpu.matmul %3, %52, %cst_24 {dimension_numbers = #tpu.dot_dimension_numbers<[1], [1], [0], [0], [0, 0, 1, 0], [], []>} : vector<32x128xf32>, vector<16x128xf32>, vector<32x16xf32> -> vector<32x16xf32>
    %cst_25 = arith.constant 2.000000e+00 : f32
    %61 = vector.broadcast %cst_25 : f32 to vector<32x16xf32>
    %62 = arith.mulf %61, %60 : vector<32x16xf32>
    %63 = vector.broadcast %56 : vector<32x1xf32> to vector<32x16xf32>
    %64 = arith.subf %63, %62 : vector<32x16xf32>
    %65 = vector.broadcast %59 : vector<1x16xf32> to vector<32x16xf32>
    %66 = arith.addf %64, %65 : vector<32x16xf32>
    %cst_26 = arith.constant 9.99999996E-13 : f32
    %67 = vector.broadcast %cst_26 : f32 to vector<32x16xf32>
    %68 = arith.maximumf %66, %67 : vector<32x16xf32>
    %69 = math.sqrt %68 : vector<32x16xf32>
    %cst_27 = arith.constant 0.000000e+00 : f32
    %70 = vector.broadcast %cst_27 : f32 to vector<32x16xf32>
    %71 = arith.subf %70, %69 : vector<32x16xf32>
    %cst_28 = arith.constant dense<0xFF800000> : vector<32xf32>
    %72 = vector.multi_reduction <maximumf>, %71, %cst_28 [1] : vector<32x16xf32> to vector<32xf32>
    %73 = vector.shape_cast %72 : vector<32xf32> to vector<32x1xf32>
    %74 = vector.broadcast %73 : vector<32x1xf32> to vector<32x16xf32>
    %75 = arith.subf %71, %74 : vector<32x16xf32>
    %76 = vector.broadcast %73 : vector<32x1xf32> to vector<32x16xf32>
    %77 = arith.subf %71, %76 : vector<32x16xf32>
    %78 = math.exp %77 : vector<32x16xf32>
    %cst_29 = arith.constant dense<0.000000e+00> : vector<32xf32>
    %79 = vector.multi_reduction <add>, %78, %cst_29 [1] : vector<32x16xf32> to vector<32xf32>
    %80 = vector.shape_cast %79 : vector<32xf32> to vector<32x1xf32>
    %81 = math.log %80 : vector<32x1xf32>
    %82 = vector.broadcast %81 : vector<32x1xf32> to vector<32x16xf32>
    %83 = arith.subf %75, %82 : vector<32x16xf32>
    %cst_30 = arith.constant 0.000000e+00 : f32
    %84 = vector.broadcast %cst_30 : f32 to vector<32x16xf32>
    %85 = arith.subf %84, %4 : vector<32x16xf32>
    %86 = arith.mulf %85, %83 : vector<32x16xf32>
    %cst_31 = arith.constant dense<0.000000e+00> : vector<32xf32>
    %87 = vector.multi_reduction <add>, %86, %cst_31 [1] : vector<32x16xf32> to vector<32xf32>
    %88 = vector.shape_cast %87 : vector<32xf32> to vector<32x1xf32>
    %89 = vector.shape_cast %88 : vector<32x1xf32> to vector<1x32x1xf32>
    %cst_32 = arith.constant dense<0.000000e+00> : vector<1xf32>
    %90 = vector.multi_reduction <add>, %89, %cst_32 [1, 2] : vector<1x32x1xf32> to vector<1xf32>
    %91 = vector.shape_cast %90 : vector<1xf32> to vector<1x1x1xf32>
    %92 = vector.extract %91[0, 0, 0] : f32 from vector<1x1x1xf32>
    %cst_33 = arith.constant 3.200000e+01 : f32
    %93 = arith.divf %92, %cst_33 : f32
    %94 = arith.mulf %0, %2 : f32
    %95 = arith.mulf %94, %35 : f32
    %96 = arith.addf %95, %93 : f32
    %c0_34 = arith.constant 0 : index
    %97 = memref.load %arg4[%c0_34] : memref<1xf32, #tpu.memory_space<smem>>
    memref.store %96, %arg4[%c0_34] : memref<1xf32, #tpu.memory_space<smem>>
    return
  }
}

</mosaic_0001>

<bundles_post_ra>
// kernel: tpu_custom_call.1
= control target key start
LH: loop header
LB: loop body
LE: loop exit
PB: predicated region body
PF: predicated region fallthrough
CT: control target
= control target key end

     0   :  { %11 = vsyncpa [#allocation4], 0  ;;  %s796_s0 = inlined_call_operand.hbm [shape: f32[3], index: 0, kind: input, shape index: {}]   ;;  %s797_s1 = inlined_call_operand.vmem [shape: f32[32,128], index: 1, kind: input, shape index: {}]   ;;  %s798_s2 = inlined_call_operand.vmem [shape: f32[32,16], index: 2, kind: input, shape index: {}]   ;;  %s799_s3 = inlined_call_operand.vmem [shape: f32[16,128], index: 3, kind: input, shape index: {}]   ;;  %s800_s4 = inlined_call_operand.hbm [shape: f32[1], index: 4, kind: output, shape index: {0}]   ;;  %s801_s5 = inlined_call_operand.hbm [shape: f32[16,128], index: 5, kind: output, shape index: {1}]  }
   0x1   :  { %12 = vsyncpa [#allocation5], 0 }
   0x2   :  { %13 = vsyncpa [#allocation3], 0  ;;  %s19_s20 = sshll.u32 %s796_s0, 4  ;;  %s628_s21 = smov [#allocation2]   ;;  %s20_s20 = int_to_ptr.hbm [resolvable:$true] %s19_s20 }
   0x3   :  { %22 = dma.hbm_to_smem %s20_s20, 16, %s628_s21, [#allocation4]  }
   0x4   :  { %622 = dma.done.wait [#allocation4], 16  }
   0x5   :  { %623 = vsyncadd [#allocation4], 4294967280 }
   0x6   :  { %33 = sfence }
   0x7   :  { %v672_v0 = vld [vmem:[%s798_s2] sm:$0xff]  ;;  %v677_v1 = vld [vmem:[%s798_s2 + $0x8] sm:$0xff]  ;;  %v682_v2 = vld [vmem:[%s798_s2 + $0x10] sm:$0xff]  ;;  %vm47_vm0 = vcmask 130048   ;;  %vm114_vm6 = vcmask 261120   ;;  %s513_s11 = sld [smem:[#allocation2 + $0x1]] }
   0x8   :  { %v687_v3 = vld [vmem:[%s798_s2 + $0x18] sm:$0xff]  ;;  %v48_v4 = vsel %vm47_vm0, %v672_v0, 0.0  ;;  %v49_v5 = vsel %vm47_vm0, %v677_v1, 0.0  ;;  %v51_v6 = vsel %vm47_vm0, %v682_v2, 0.0  ;;  %v705_v25 = vld [vmem:[%s797_s1 + $0x10] sm:$0xff]  ;;  %v711_v28 = vld [vmem:[%s797_s1 + $0x8] sm:$0xff] }
   0x9   :  { %v50_v7 = vadd.f32 %v49_v5, %v48_v4  ;;  %v53_v8 = vsel %vm47_vm0, %v687_v3, 0.0  ;;  %v700_v24 = vld [vmem:[%s797_s1 + $0x18] sm:$0xff]  ;;  %v722_v35 = vld [vmem:[%s797_s1] sm:$0xff]  ;;  %s725_s1 = sld [smem:[#allocation2]]  ;;  %v46_v42 = vld [vmem:[%s799_s3 + $0x8] sm:$0xff]  ;;  %v250_v55 = vmul.f32 %v711_v28, %v711_v28  ;;  %v251_v56 = vmul.f32 %v705_v25, %v705_v25  ;;  %s494_s21 = sshll.u32 %s801_s5, 4  ;;  %s495_s21 = int_to_ptr.hbm [resolvable:$true] %s494_s21 }
   0xa   :  { %133 = vmatpush.msra.mxu0 %v700_v24  ;;  %v249_v44 = vmul.f32 %v722_v35, %v722_v35  ;;  %v45_v54 = vld [vmem:[%s799_s3] sm:$0xff]  ;;  %v252_v4 = vmul.f32 %v700_v24, %v700_v24  ;;  %s631_s3 = smov [#allocation7]   ;;  %s632_s22 = smov 128  }
   0xb   :  { %v52_v9 = vadd.f32 %v51_v6, %v50_v7  ;;  %s492_s18 = sshll.u32 %s631_s3, 4  ;;  %s633_s23 = smov 8   ;;  %s493_s18 = int_to_ptr.vmem [resolvable:$true] %s492_s18 }
   0xc   :  { %134 = vmatpush.msra.mxu0 %v705_v25  ;;  %253 = vadd.xlane.f32.xlu2 %v249_v44  ;;  %s514_s5 = sld [smem:[#allocation2 + $0x2]]  ;;  %s484_s29 = sshll.u32 %s800_s4, 4  ;;  %s485_s29 = int_to_ptr.hbm [resolvable:$true] %s484_s29 }
   0xd   :  { %v54_v10 = vadd.f32 %v53_v8, %v52_v9  ;;  %s232_s12 = ssub.f32 1.0, %s513_s11  ;;  %v229_v46 = vstv %s513_s11  ;;  %s635_s9 = smov [#allocation6]  }
   0xe   :  { %135 = vmatpush.msra.mxu0 %v711_v28 }
   0xf   :  { %v55_v11 = vrot.slane %v54_v10, 4  ;;  %v233_v43 = vstv %s232_s12  ;;  %s241_s15 = ssub.f32 1.0, %s725_s1  ;;  %v238_v51 = vstv %s725_s1 }
  0x10   :  { %136 = vmatpush.msra.mxu0 %v722_v35  ;;  %v235_v47 = vmul.f32 %v233_v43, %v46_v42  ;;  %v234_v59 = vmul.f32 %v233_v43, %v45_v54 }
  0x11   :  { %v56_v12 = vadd.f32 %v55_v11, %v54_v10  ;;  %v242_v49 = vstv %s241_s15  ;;  %v629_v10 = vmov 1.0  }
  0x12   :  { %v244_v53 = vmul.f32 %v242_v49, %v46_v42  ;;  %v243_v6 = vmul.f32 %v242_v49, %v45_v54  ;;  %s474_s26 = smul.f32 %s514_s5, %s725_s1 }
  0x13   :  { %v57_v13 = vrot.slane %v56_v12, 2 }
  0x14   :  { %255 = vadd.xlane.f32.xlu2 %v250_v55 }
  0x15   :  { %v58_v14 = vadd.f32 %v57_v13, %v56_v12 }
  0x17   :  { %v59_v15 = vrot.slane %v58_v14, 1 }
  0x19   :  { %v60_v16 = vadd.f32 %v59_v15, %v58_v14 }
  0x1b   :  { %vm61_vm1 = vcmp.gt.f32.partialorder %v60_v16, 0.0 }
  0x1c   :  { %v62_v17 = vsel %vm61_vm1, %v60_v16, 1.0  ;;  %259 = vadd.xlane.f32.xlu2 %v252_v4 }
  0x1d   :  { %536 = vrcp.f32 %v62_v17  ;;  %v74_v20 = vand.u32 2147483648, %v62_v17  ;;  %vm68_vm2 = vweird.f32 %v62_v17  ;;  %v72_v22 = vand.u32 2147483647, %v62_v17 }
  0x1f   :  { %v75_v26 = vor.u32 1.1754944e-38, %v74_v20  ;;  %vm73_vm5 = vcmp.eq.f32.partialorder %v72_v22, 8.507059e+37 }
  0x23   :  { %v537_v18 = vpop.eup %536 }
  0x24   :  { %v64_v19 = vmul.f32 %v537_v18, %v62_v17  ;;  %vm69_vm3 = vweird.f32 %v537_v18 }
  0x25   :  { %vm70_vm4 = vmor %vm68_vm2, %vm69_vm3  ;;  %vm199_vm2 = vcmask 7168  }
  0x26   :  { %v65_v21 = vsub.f32 1.0, %v64_v19 }
  0x28   :  { %v66_v23 = vmul.f32 %v537_v18, %v65_v21 }
  0x2a   :  { %v67_v27 = vadd.f32 %v537_v18, %v66_v23 }
  0x2c   :  { %v71_v29 = vsel %vm70_vm4, %v537_v18, %v67_v27 }
  0x2d   :  { %v76_v30 = vsel %vm73_vm5, %v75_v26, %v71_v29 }
  0x2e   :  { %v78_v31 = vmul.f32 %v76_v30, %v672_v0  ;;  %v79_v32 = vmul.f32 %v76_v30, %v677_v1  ;;  %v80_v33 = vmul.f32 %v76_v30, %v682_v2  ;;  %v81_v34 = vmul.f32 %v76_v30, %v687_v3 }
  0x30   :  { %82 = vxpose.xlu0.b32.start [1/4] (short) (narrow) %v78_v31, 16 }
  0x38   :  { %83 = vxpose.xlu0.b32.cont [2/4] (short) (narrow) %v79_v32, 16 }
  0x40   :  { %84 = vxpose.xlu0.b32.cont [3/4] (short) (narrow) %v80_v33, 16 }
  0x48   :  { %85 = vxpose.xlu0.b32.end [4/4] (short) (narrow) %v81_v34, 16 }
  0x7f   :  { %v254_v11 = vpop.xlane.xlu2 %253 }
  0x87   :  { %v256_v13 = vpop.xlane.xlu2 %255 }
  0x8f   :  { %v260_v32 = vpop.xlane.xlu2 %259 }
  0xd4   :  { %v98_v36 = vpop.trf.xlu0 }
  0xd5   :  { %515 = vmatmul.msk.f32.vlgmr.msra.gmra.mxu0 %vm114_vm6, %v98_v36 }
  0xdc   :  { %v99_v37 = vpop.trf.xlu0 }
  0xdd   :  { %516 = vmatmul.msk.f32.gmra.mxu0 %vm114_vm6, %v99_v37 }
 0x152   :  { %v138_v38 = vpop.f32.mrf.mxu0 }
 0x153   :  { %v191_v41 = vmul.f32 %v138_v38, %v138_v38 }
 0x15a   :  { %v141_v39 = vpop.f32.mrf.mxu0 }
 0x15b   :  { %158 = vmatpush.xpose.msra.mxu1 %v141_v39  ;;  %v192_v40 = vmul.f32 %v141_v39, %v141_v39 }
 0x15d   :  { %195 = vadd.xlane.f32.xlu1 %v192_v40 }
 0x15f   :  { %159 = vmatpush.xpose.msra.mxu1 %v138_v38 }
 0x162   :  { %160 = vmatmul.f32.vlgmr.msra.gmra.mxu1 %v138_v38 }
 0x165   :  { %193 = vadd.xlane.f32.xlu1 %v191_v41 }
 0x16a   :  { %163 = vmatmul.f32.gmra.mxu1 %v141_v39 }
 0x16d   :  { %257 = vadd.xlane.f32.xlu1 %v251_v56 }
 0x1d0   :  { %v733_v45 = vpop.xlane.xlu1 %195 }
 0x1d1   :  { %vm222_vm7 = vcmp.gt.f32.partialorder %v733_v45, 0.0 }
 0x1d2   :  { %v228_v48 = vsel %vm222_vm7, %v141_v39, %v46_v42 }
 0x1d3   :  { %v231_v50 = vmul.f32 %v229_v46, %v228_v48 }
 0x1d5   :  { %v237_v52 = vadd.f32 %v235_v47, %v231_v50 }
 0x1d7   :  { %v240_v57 = vmul.f32 %v238_v51, %v237_v52 }
 0x1d8   :  { %v744_v58 = vpop.xlane.xlu1 %193 }
 0x1d9   :  { %vm221_vm8 = vcmp.gt.f32.partialorder %v744_v58, 0.0  ;;  %v246_v60 = vadd.f32 %v244_v53, %v240_v57 }
 0x1da   :  { %v227_v61 = vsel %vm221_vm8, %v138_v38, %v45_v54 }
 0x1db   :  { %v230_v62 = vmul.f32 %v229_v46, %v227_v61  ;;  %517 = vmatpush.xpose.msra.mxu3 %v246_v60  ;;  %248 = vst [vmem:[#allocation7 + $0x8] sm:$0xff] %v246_v60  ;;  %v262_v63 = vmul.f32 %v246_v60, %v246_v60 }
 0x1dd   :  { %v236_v5 = vadd.f32 %v234_v59, %v230_v62  ;;  %277 = vmatpush.xpose.msra.mxu2 %v262_v63 }
 0x1df   :  { %v239_v7 = vmul.f32 %v238_v51, %v236_v5 }
 0x1e0   :  { %v258_v21 = vpop.xlane.xlu1 %257 }
 0x1e1   :  { %v245_v8 = vadd.f32 %v243_v6, %v239_v7 }
 0x1e3   :  { %518 = vmatpush.xpose.msra.mxu3 %v245_v8  ;;  %247 = vst [vmem:[#allocation7] sm:$0xff] %v245_v8  ;;  %v261_v9 = vmul.f32 %v245_v8, %v245_v8 }
 0x1e4   :  { %500 = dma.vmem_to_hbm [thread:$0]  %s493_s18, 256, %s495_s21, [#allocation3], %s632_s22, %s632_s22, %s633_s23  }
 0x1e5   :  { %278 = vmatpush.xpose.msra.mxu2 %v261_v9 }
 0x1e6   :  { %302 = vmatmul.f32.vlgmr.msra.gmra.mxu3 %v711_v28 }
 0x1e8   :  { %279 = vmatmul.f32.vlgmr.msra.gmra.mxu2 %v629_v10 }
 0x1e9   :  { %297 = vmatpush.xpose.msrb.mxu2 %v246_v60 }
 0x1ed   :  { %298 = vmatpush.xpose.msrb.mxu2 %v245_v8 }
 0x1ee   :  { %305 = vmatmul.f32.gmra.mxu3 %v705_v25 }
 0x1f0   :  { %299 = vmatmul.f32.vlgmr.msrb.gmra.mxu2 %v722_v35 }
 0x1f6   :  { %308 = vmatmul.f32.gmra.mxu3 %v700_v24 }
 0x269   :  { %v303_v12 = vpop.f32.mrf.mxu3 }
 0x26a   :  { %v313_v14 = vmul.f32 2.0, %v303_v12 }
 0x26b   :  { %v280_v15 = vpop.f32.mrf.mxu2 }
 0x26c   :  { %v317_v16 = vsub.f32 %v256_v13, %v313_v14  ;;  %v320_v17 = vperm.slane %v280_v15, 0 }
 0x26e   :  { %v322_v18 = vadd.f32 %v320_v17, %v317_v16 }
 0x270   :  { %v326_v19 = vmax.f32 %v322_v18, 1e-12 }
 0x271   :  { %v306_v20 = vpop.f32.mrf.mxu3 }
 0x272   :  { %v314_v22 = vmul.f32 2.0, %v306_v20  ;;  %538 = vrsqrt.f32 %v326_v19  ;;  %vm348_vm9 = vcmp.eq.f32.partialorder %v326_v19, inf  ;;  %v351_v50 = vand.u32 2147483648, %v326_v19 }
 0x273   :  { %v300_v23 = vpop.f32.mrf.mxu2  ;;  %vm350_vm10 = vcmp.eq.f32.partialorder %v326_v19, 0.0 }
 0x274   :  { %v318_v26 = vsub.f32 %v258_v21, %v314_v22  ;;  %v312_v25 = vmul.f32 2.0, %v300_v23 }
 0x276   :  { %v323_v27 = vadd.f32 %v320_v17, %v318_v26  ;;  %v316_v28 = vsub.f32 %v254_v11, %v312_v25  ;;  %v161_v11 = vpop.f32.mrf.mxu1 }
 0x278   :  { %v539_v29 = vpop.eup %538  ;;  %v327_v24 = vmax.f32 %v323_v27, 1e-12  ;;  %v321_v30 = vadd.f32 %v320_v17, %v316_v28 }
 0x279   :  { %v309_v31 = vpop.f32.mrf.mxu3  ;;  %v342_v33 = vmul.f32 %v539_v29, %v326_v19 }
 0x27a   :  { %v325_v34 = vmax.f32 %v321_v30, 1e-12  ;;  %v315_v35 = vmul.f32 2.0, %v309_v31  ;;  %540 = vrsqrt.f32 %v327_v24  ;;  %vm360_vm11 = vcmp.eq.f32.partialorder %v327_v24, inf }
 0x27b   :  { %v343_v36 = vmul.f32 %v539_v29, %v342_v33  ;;  %v363_v7 = vand.u32 2147483648, %v327_v24  ;;  %vm362_vm12 = vcmp.eq.f32.partialorder %v327_v24, 0.0 }
 0x27c   :  { %v319_v37 = vsub.f32 %v260_v32, %v315_v35  ;;  %542 = vrsqrt.f32 %v325_v34  ;;  %vm336_vm13 = vcmp.eq.f32.partialorder %v325_v34, inf  ;;  %v339_v13 = vand.u32 2147483648, %v325_v34 }
 0x27d   :  { %v344_v38 = vmul.f32 0.5, %v343_v36  ;;  %vm338_vm14 = vcmp.eq.f32.partialorder %v325_v34, 0.0 }
 0x27e   :  { %v324_v39 = vadd.f32 %v320_v17, %v319_v37 }
 0x27f   :  { %v345_v40 = vsub.f32 1.5, %v344_v38 }
 0x280   :  { %v541_v41 = vpop.eup %540  ;;  %v328_v42 = vmax.f32 %v324_v39, 1e-12 }
 0x281   :  { %v346_v43 = vmul.f32 %v539_v29, %v345_v40  ;;  %v354_v44 = vmul.f32 %v541_v41, %v327_v24 }
 0x282   :  { %v543_v46 = vpop.eup %542  ;;  %544 = vrsqrt.f32 %v328_v42  ;;  %vm372_vm15 = vcmp.eq.f32.partialorder %v328_v42, inf  ;;  %v375_v26 = vand.u32 2147483648, %v328_v42  ;;  %vm374_vm1 = vcmp.eq.f32.partialorder %v328_v42, 0.0 }
 0x283   :  { %v347_v47 = vmul.f32 %v346_v43, %v326_v19  ;;  %v355_v48 = vmul.f32 %v541_v41, %v354_v44  ;;  %v330_v49 = vmul.f32 %v543_v46, %v325_v34 }
 0x285   :  { %v349_v51 = vsel %vm348_vm9, %v326_v19, %v347_v47  ;;  %v356_v52 = vmul.f32 0.5, %v355_v48  ;;  %v331_v53 = vmul.f32 %v543_v46, %v330_v49  ;;  %v167_v19 = vsel %vm47_vm0, %v161_v11, -inf }
 0x286   :  { %v352_v54 = vsel %vm350_vm10, %v351_v50, %v349_v51 }
 0x287   :  { %v378_v55 = vsub.f32 0.0, %v352_v54  ;;  %v357_v56 = vsub.f32 1.5, %v356_v52  ;;  %v332_v57 = vmul.f32 0.5, %v331_v53 }
 0x288   :  { %v545_v59 = vpop.eup %544 }
 0x289   :  { %v384_v60 = vsel %vm47_vm0, %v378_v55, -inf  ;;  %v358_v61 = vmul.f32 %v541_v41, %v357_v56  ;;  %v333_v62 = vsub.f32 1.5, %v332_v57  ;;  %v366_v63 = vmul.f32 %v545_v59, %v328_v42 }
 0x28a   :  { %385 = vmax.xlane.f32.xlu2 %v384_v60 }
 0x28b   :  { %v359_v4 = vmul.f32 %v358_v61, %v327_v24  ;;  %v334_v5 = vmul.f32 %v543_v46, %v333_v62  ;;  %v367_v6 = vmul.f32 %v545_v59, %v366_v63 }
 0x28d   :  { %v361_v8 = vsel %vm360_vm11, %v327_v24, %v359_v4  ;;  %v335_v9 = vmul.f32 %v334_v5, %v325_v34  ;;  %v368_v10 = vmul.f32 0.5, %v367_v6  ;;  %v164_v24 = vpop.f32.mrf.mxu1  ;;  %v430_v6 = vsub.f32 0.0, %v677_v1 }
 0x28e   :  { %v364_v12 = vsel %vm362_vm12, %v363_v7, %v361_v8  ;;  %v170_v30 = vsel %vm47_vm0, %v164_v24, -inf }
 0x28f   :  { %v379_v14 = vsub.f32 0.0, %v364_v12  ;;  %v337_v15 = vsel %vm336_vm13, %v325_v34, %v335_v9  ;;  %v369_v16 = vsub.f32 1.5, %v368_v10 }
 0x290   :  { %v340_v17 = vsel %vm338_vm14, %v339_v13, %v337_v15  ;;  %v429_v15 = vsub.f32 0.0, %v672_v0 }
 0x291   :  { %v387_v18 = vsel %vm47_vm0, %v379_v14, -inf  ;;  %v377_v20 = vsub.f32 0.0, %v340_v17  ;;  %v370_v21 = vmul.f32 %v545_v59, %v369_v16 }
 0x292   :  { %388 = vmax.xlane.f32.xlu0 %v387_v18  ;;  %168 = vmax.xlane.f32.xlu2 %v167_v19 }
 0x293   :  { %v381_v22 = vsel %vm47_vm0, %v377_v20, -inf  ;;  %v371_v23 = vmul.f32 %v370_v21, %v328_v42 }
 0x294   :  { %382 = vmax.xlane.f32.xlu1 %v381_v22 }
 0x295   :  { %v373_v25 = vsel %vm372_vm15, %v328_v42, %v371_v23  ;;  %v431_v23 = vsub.f32 0.0, %v682_v2 }
 0x296   :  { %v376_v27 = vsel %vm374_vm1, %v375_v26, %v373_v25  ;;  %v432_v25 = vsub.f32 0.0, %v687_v3 }
 0x297   :  { %v380_v28 = vsub.f32 0.0, %v376_v27 }
 0x299   :  { %v390_v29 = vsel %vm47_vm0, %v380_v28, -inf }
 0x29c   :  { %391 = vmax.xlane.f32.xlu1 %v390_v29 }
 0x2a4   :  { %171 = vmax.xlane.f32.xlu1 %v170_v30 }
 0x2fd   :  { %v386_v31 = vpop.xlane.xlu2 %385 }
 0x2fe   :  { %v394_v32 = vsub.f32 %v378_v55, %v386_v31 }
 0x300   :  { %v399_v33 = vmul.f32 1.442695, %v394_v32 }
 0x302   :  { %546 = vpow2.f32 %v399_v33 }
 0x305   :  { %v389_v34 = vpop.xlane.xlu0 %388  ;;  %v763_v42 = vpop.xlane.xlu2 %168 }
 0x306   :  { %v760_v39 = vsub.f32 %v379_v14, %v389_v34  ;;  %v173_v47 = vsub.f32 %v161_v11, %v763_v42 }
 0x307   :  { %v383_v35 = vpop.xlane.xlu1 %382 }
 0x308   :  { %v547_v36 = vpop.eup %546  ;;  %v393_v37 = vsub.f32 %v377_v20, %v383_v35  ;;  %v401_v41 = vmul.f32 1.442695, %v760_v39  ;;  %v175_v50 = vmul.f32 1.442695, %v173_v47 }
 0x309   :  { %v408_v38 = vsel %vm47_vm0, %v547_v36, 0.0 }
 0x30a   :  { %v397_v40 = vmul.f32 1.442695, %v393_v37  ;;  %409 = vadd.xlane.f32.xlu1 %v408_v38 }
 0x30c   :  { %548 = vpow2.f32 %v397_v40 }
 0x30d   :  { %550 = vpow2.f32 %v401_v41 }
 0x30f   :  { %v392_v43 = vpop.xlane.xlu1 %391 }
 0x310   :  { %v396_v44 = vsub.f32 %v380_v28, %v392_v43 }
 0x312   :  { %v549_v46 = vpop.eup %548  ;;  %v403_v48 = vmul.f32 1.442695, %v396_v44 }
 0x313   :  { %v405_v49 = vsel %vm47_vm0, %v549_v46, 0.0  ;;  %v551_v52 = vpop.eup %550 }
 0x314   :  { %552 = vpow2.f32 %v403_v48  ;;  %406 = vadd.xlane.f32.xlu2 %v405_v49  ;;  %v411_v56 = vsel %vm47_vm0, %v551_v52, 0.0 }
 0x315   :  { %554 = vpow2.f32 %v175_v50 }
 0x317   :  { %v172_v51 = vpop.xlane.xlu1 %171 }
 0x318   :  { %v174_v53 = vsub.f32 %v164_v24, %v172_v51 }
 0x31a   :  { %v553_v54 = vpop.eup %552  ;;  %v177_v55 = vmul.f32 1.442695, %v174_v53 }
 0x31b   :  { %v414_v57 = vsel %vm47_vm0, %v553_v54, 0.0  ;;  %v555_v59 = vpop.eup %554 }
 0x31c   :  { %556 = vpow2.f32 %v177_v55  ;;  %412 = vadd.xlane.f32.xlu2 %v411_v56  ;;  %415 = vadd.xlane.f32.xlu1 %v414_v57  ;;  %v179_v61 = vsel %vm47_vm0, %v555_v59, 0.0 }
 0x322   :  { %v557_v60 = vpop.eup %556 }
 0x323   :  { %v182_v62 = vsel %vm47_vm0, %v557_v60, 0.0 }
 0x324   :  { %180 = vadd.xlane.f32.xlu2 %v179_v61  ;;  %183 = vadd.xlane.f32.xlu1 %v182_v62 }
 0x37d   :  { %v410_v63 = vpop.xlane.xlu1 %409 }
 0x37e   :  { %558 = vlog2.f32 %v410_v63 }
 0x384   :  { %v559_v4 = vpop.eup %558 }
 0x385   :  { %v420_v5 = vmul.f32 0.6931472, %v559_v4 }
 0x387   :  { %v426_v7 = vsub.f32 %v394_v32, %v420_v5  ;;  %v407_v8 = vpop.xlane.xlu2 %406  ;;  %v634_v5 = vmov 32.0  }
 0x388   :  { %560 = vlog2.f32 %v407_v8 }
 0x389   :  { %v434_v9 = vmul.f32 %v430_v6, %v426_v7 }
 0x38b   :  { %v440_v10 = vsel %vm47_vm0, %v434_v9, 0.0 }
 0x38c   :  { %441 = vadd.xlane.f32.xlu1 %v440_v10 }
 0x38e   :  { %v561_v11 = vpop.eup %560 }
 0x38f   :  { %v418_v12 = vmul.f32 0.6931472, %v561_v11  ;;  %v413_v13 = vpop.xlane.xlu2 %412  ;;  %v416_v14 = vpop.xlane.xlu1 %415 }
 0x390   :  { %562 = vlog2.f32 %v413_v13 }
 0x391   :  { %v425_v16 = vsub.f32 %v393_v37, %v418_v12  ;;  %564 = vlog2.f32 %v416_v14 }
 0x393   :  { %v433_v17 = vmul.f32 %v429_v15, %v425_v16 }
 0x395   :  { %v437_v18 = vsel %vm47_vm0, %v433_v17, 0.0 }
 0x396   :  { %v563_v1 = vpop.eup %562  ;;  %438 = vadd.xlane.f32.xlu2 %v437_v18 }
 0x397   :  { %v565_v19 = vpop.eup %564  ;;  %v422_v20 = vmul.f32 0.6931472, %v563_v1  ;;  %v181_v21 = vpop.xlane.xlu2 %180 }
 0x398   :  { %v184_v22 = vpop.xlane.xlu1 %183  ;;  %v424_v26 = vmul.f32 0.6931472, %v565_v19  ;;  %566 = vlog2.f32 %v181_v21 }
 0x399   :  { %v427_v0 = vsub.f32 %v760_v39, %v422_v20  ;;  %568 = vlog2.f32 %v184_v22 }
 0x39a   :  { %v428_v27 = vsub.f32 %v396_v44, %v424_v26  ;;  %v630_v44 = vmov 16.0  }
 0x39b   :  { %v435_v28 = vmul.f32 %v431_v23, %v427_v0  ;;  %570 = vrcp.f32 %v630_v44 }
 0x39c   :  { %v436_v29 = vmul.f32 %v432_v25, %v428_v27  ;;  %572 = vrcp.f32 %v634_v5 }
 0x39d   :  { %v443_v24 = vsel %vm47_vm0, %v435_v28, 0.0 }
 0x39e   :  { %v567_v30 = vpop.eup %566  ;;  %444 = vadd.xlane.f32.xlu2 %v443_v24  ;;  %v446_v31 = vsel %vm47_vm0, %v436_v29, 0.0 }
 0x39f   :  { %v569_v32 = vpop.eup %568  ;;  %v186_v33 = vmul.f32 0.6931472, %v567_v30  ;;  %447 = vadd.xlane.f32.xlu1 %v446_v31 }
 0x3a0   :  { %v188_v2 = vmul.f32 0.6931472, %v569_v32 }
 0x3a1   :  { %v189_v34 = vadd.f32 %v186_v33, %v763_v42  ;;  %v571_v49 = vpop.eup %570 }
 0x3a2   :  { %v190_v35 = vadd.f32 %v188_v2, %v172_v51  ;;  %v213_v52 = vmul.f32 16.0, %v571_v49  ;;  %vm217_vm0 = vweird.f32 %v571_v49  ;;  %v573_v6 = vpop.eup %572 }
 0x3a3   :  { %v197_v3 = vsub.f32 %v189_v34, %v744_v58  ;;  %v466_v7 = vmul.f32 32.0, %v573_v6  ;;  %vm470_vm3 = vweird.f32 %v573_v6 }
 0x3a4   :  { %v198_v36 = vsub.f32 %v190_v35, %v733_v45  ;;  %v214_v53 = vsub.f32 1.0, %v213_v52 }
 0x3a5   :  { %v200_v37 = vsel %vm199_vm2, %v197_v3, 0.0  ;;  %v467_v8 = vsub.f32 1.0, %v466_v7 }
 0x3a6   :  { %v201_v38 = vsel %vm199_vm2, %v198_v36, 0.0  ;;  %v215_v57 = vmul.f32 %v571_v49, %v214_v53 }
 0x3a7   :  { %v202_v39 = vadd.f32 %v201_v38, %v200_v37  ;;  %v468_v12 = vmul.f32 %v573_v6, %v467_v8 }
 0x3a8   :  { %v216_v61 = vadd.f32 %v571_v49, %v215_v57 }
 0x3a9   :  { %203 = vadd.xlane.f32.xlu2 %v202_v39  ;;  %v469_v15 = vadd.f32 %v573_v6, %v468_v12 }
 0x3aa   :  { %v218_v4 = vsel %vm217_vm0, %v571_v49, %v216_v61 }
 0x3ab   :  { %v471_v18 = vsel %vm470_vm3, %v573_v6, %v469_v15 }
 0x3ff   :  { %v442_v41 = vpop.xlane.xlu1 %441 }
 0x400   :  { %v450_v42 = vsel %vm199_vm2, %v442_v41, 0.0 }
 0x409   :  { %v439_v40 = vpop.xlane.xlu2 %438 }
 0x40a   :  { %v449_v43 = vsel %vm199_vm2, %v439_v40, 0.0 }
 0x40b   :  { %v451_v46 = vadd.f32 %v450_v42, %v449_v43 }
 0x411   :  { %v445_v47 = vpop.xlane.xlu2 %444 }
 0x412   :  { %v452_v58 = vsel %vm199_vm2, %v445_v47, 0.0  ;;  %v448_v48 = vpop.xlane.xlu1 %447 }
 0x413   :  { %v453_v45 = vadd.f32 %v452_v58, %v451_v46  ;;  %v454_v50 = vsel %vm199_vm2, %v448_v48, 0.0 }
 0x415   :  { %v455_v51 = vadd.f32 %v454_v50, %v453_v45 }
 0x417   :  { %456 = vadd.xlane.f32.xlu1 %v455_v51 }
 0x41c   :  { %v204_v54 = vpop.xlane.xlu2 %203 }
 0x41d   :  { %v205_v55 = vrot.slane %v204_v54, 4 }
 0x41f   :  { %v206_v56 = vadd.f32 %v205_v55, %v204_v54 }
 0x421   :  { %v207_v59 = vrot.slane %v206_v56, 2 }
 0x423   :  { %v208_v60 = vadd.f32 %v207_v59, %v206_v56 }
 0x425   :  { %v209_v62 = vrot.slane %v208_v60, 1 }
 0x427   :  { %v210_v63 = vadd.f32 %v209_v62, %v208_v60 }
 0x429   :  { %519 = vpush %v210_v63 }
 0x42a   :  { %521 = vpush %v218_v4 }
 0x45a   :  { %s520_s24 = spop %519 }
 0x45b   :  { %s522_s25 = spop %521 }
 0x45c   :  { %s220_s27 = smul.f32 %s522_s25, %s520_s24 }
 0x45e   :  { %s475_s30 = smul.f32 %s474_s26, %s220_s27 }
 0x48a   :  { %v457_v9 = vpop.xlane.xlu1 %456 }
 0x48b   :  { %v458_v10 = vrot.slane %v457_v9, 4 }
 0x48d   :  { %v459_v11 = vadd.f32 %v458_v10, %v457_v9 }
 0x48f   :  { %v460_v13 = vrot.slane %v459_v11, 2 }
 0x491   :  { %v461_v14 = vadd.f32 %v460_v13, %v459_v11 }
 0x493   :  { %v462_v16 = vrot.slane %v461_v14, 1 }
 0x495   :  { %v463_v17 = vadd.f32 %v462_v16, %v461_v14 }
 0x497   :  { %523 = vpush %v463_v17 }
 0x498   :  { %525 = vpush %v471_v18 }
 0x4c8   :  { %s524_s0 = spop %523 }
 0x4c9   :  { %s526_s6 = spop %525 }
 0x4ca   :  { %s473_s7 = smul.f32 %s526_s6, %s524_s0 }
 0x4cc   :  { %s476_s8 = sadd.f32 %s475_s30, %s473_s7 }
 0x4ce   :  { %478 = sst [smem:[#allocation6]] %s476_s8 }
 0x4cf   :  { %487 = dma.smem_to_hbm %s635_s9, 16, %s485_s29, [#allocation5]  }
 0x4d0   :  { %624 = dma.done.wait [#allocation5], 16  }
 0x4d1   :  { %625 = vsyncadd [#allocation5], 4294967280 }
 0x4d2   :  { %626 = dma.done.wait [#allocation3], 256  }
 0x4d3   :  { %627 = vsyncadd [#allocation3], 4294967040 }
 0x4d4   :  { %509 = sfence }
 0x4d5   :  { %510 = vsyncpa [#allocation3], 1 }
 0x4d6   :  { %511 = vsyncpa [#allocation4], 1 }
 0x4d7   :  { %512 = vsyncpa [#allocation5], 1 }

</bundles_post_ra>
